<compile_context>
chip_gen: v6e
topology: v6e:2x2x1
jax: 0.10.0
libtpu: 0.0.40
codegen_flags: <defaults>
</compile_context>

<pallas_src>
import jax
import jax.numpy as jnp
from jax import lax
from jax.experimental import pallas as pl
from jax.experimental.pallas import tpu as pltpu

_EPS = 1e-8
_EPS2 = float(_EPS * _EPS)      # torch clamps the product of squared norms by eps^2
_INV_EPS = float(1.0 / _EPS)

# Tile caps (f32): x 256x2048 + w 2048x1024 + out 256x1024, double-buffered
# inputs, totals ~22 MiB -> well under the 48 MiB limit we request.
_TM_CAP = 256
_TN_CAP = 1024
_TK_CAP = 2048


def _round_up(x, m):
    return -(-x // m) * m


def _plan(dim, granule, cap):
    """Pick (tile, padded_dim) with near-minimal padding.

    dim <= cap  -> one full-extent tile, no padding (block dim == array dim is
                   always legal, even when unaligned).
    dim >  cap  -> split into ceil/cap tiles of granule-aligned size; padding
                   waste stays below n_tiles * granule.
    """
    if dim <= cap:
        return dim, dim
    dp = _round_up(dim, granule)
    n = -(-dp // cap)
    tile = _round_up(-(-dp // n), granule)
    return tile, tile * n


def _cosine_kernel(x_ref, w_ref, o_ref, xn2_ref, wn2_ref):
    # x_ref: (tm, tk), w_ref: (tk, tn), o_ref: (tm, tn) f32 (resident across k)
    # xn2_ref: (tm, 1) f32 scratch, wn2_ref: (1, tn) f32 scratch
    k = pl.program_id(2)
    nk = pl.num_programs(2)

    @pl.when(k == 0)
    def _init():
        o_ref[...] = jnp.zeros_like(o_ref)
        xn2_ref[...] = jnp.zeros_like(xn2_ref)
        wn2_ref[...] = jnp.zeros_like(wn2_ref)

    x = x_ref[...]
    w = w_ref[...]

    # MXU hot path: accumulate partial dot products straight into the output.
    o_ref[...] += jnp.dot(x, w, preferred_element_type=jnp.float32)
    # Norm reductions ride the VPU/XLU slots (data already in VMEM for the dot).
    xn2_ref[...] += jnp.sum(x * x, axis=1, keepdims=True)
    wn2_ref[...] += jnp.sum(w * w, axis=0, keepdims=True)

    @pl.when(k == nk - 1)
    def _finalize():
        xn2 = xn2_ref[...]                       # (tm, 1)
        wn2 = wn2_ref[...]                       # (1, tn)
        rx = lax.rsqrt(xn2)                      # EUP
        rw = lax.rsqrt(wn2)                      # EUP
        prod = xn2 * wn2                         # (tm, tn)
        # torch clamps the product of squared norms by eps^2 before the sqrt.
        # Keep this as a select: the unselected rsqrt(0)=inf branch must never
        # be mixed arithmetically (0*inf -> NaN).
        scale = jnp.where(prod < _EPS2, _INV_EPS, rx * rw)
        o_ref[...] = o_ref[...] * scale


@jax.jit
def cosine_layer_forward(x, weight):
    """x: (B, D) f32, weight: (1, D, C) f32 (torch parameter layout)."""
    w = weight[0]                                # (D, C)
    B, D = x.shape
    Dw, C = w.shape
    assert D == Dw

    x = x.astype(jnp.float32)
    w = w.astype(jnp.float32)

    tm, Bp = _plan(B, 8, _TM_CAP)
    tn, Cp = _plan(C, 128, _TN_CAP)
    tk, Dp = _plan(D, 128, _TK_CAP)

    # Only pad when a dim exceeds its cap; D (reduction) padding must be zero.
    if Bp != B or Dp != D:
        x = jnp.pad(x, ((0, Bp - B), (0, Dp - D)))
    if Dp != D or Cp != C:
        w = jnp.pad(w, ((0, Dp - D), (0, Cp - C)))

    grid = (Bp // tm, Cp // tn, Dp // tk)

    out = pl.pallas_call(
        _cosine_kernel,
        out_shape=jax.ShapeDtypeStruct((Bp, Cp), jnp.float32),
        grid_spec=pltpu.PrefetchScalarGridSpec(
            num_scalar_prefetch=0,
            grid=grid,
            in_specs=[
                pl.BlockSpec((tm, tk), lambda i, j, k: (i, k)),
                pl.BlockSpec((tk, tn), lambda i, j, k: (k, j)),
            ],
            out_specs=pl.BlockSpec((tm, tn), lambda i, j, k: (i, j)),
            scratch_shapes=[
                pltpu.VMEM((tm, 1), jnp.float32),
                pltpu.VMEM((1, tn), jnp.float32),
            ],
        ),
        compiler_params=pltpu.CompilerParams(
            dimension_semantics=("parallel", "parallel", "arbitrary"),
            vmem_limit_bytes=48 * 1024 * 1024,
        ),
    )(x, w)

    if Bp != B or Cp != C:
        out = out[:B, :C]
    return out


def _reference(x, weight):
    w = weight[0]                                               # (D, C)
    dot = jnp.dot(x, w, precision=jax.lax.Precision.HIGHEST)    # (B, C)
    xn2 = jnp.sum(x * x, axis=1, keepdims=True)                 # (B, 1)
    wn2 = jnp.sum(w * w, axis=0, keepdims=True)                 # (1, C)
    return dot / jnp.sqrt(jnp.maximum(xn2 * wn2, _EPS * _EPS))


if __name__ == "__main__":
    key = jax.random.PRNGKey(0)

    def _check(B, D, C, key):
        kx, kw, key = jax.random.split(key, 3)
        weight = jax.random.uniform(kw, (1, D, C), dtype=jnp.float32)  # torch.rand-style
        x = jax.random.normal(kx, (B, D), dtype=jnp.float32)
        out = jax.block_until_ready(cosine_layer_forward(x, weight))
        ref = _reference(x, weight)
        assert out.shape == (B, C)
        assert jnp.allclose(out, ref, atol=2e-3, rtol=2e-3), (
            f"mismatch at B={B}, D={D}, C={C}: "
            f"max abs err {float(jnp.max(jnp.abs(out - ref)))}")
        return key

    # 1) Shapes implied by the module (out_classes=16, dimensions=32): tiny,
    #    unaligned dims handled as full-extent tiles, no padding.
    key = _check(8, 32, 16, key)

    # 2) Unaligned C (=300), D=1024: single tile per dim, grid (1,1,1),
    #    still no padded copies of W/X.
    key = _check(16, 1024, 300, key)

    # 3) Exercises B-splitting + multi-step reduction (k loop) + minimal
    #    granule padding on B only.
    key = _check(264, 4096, 272, key)

    print("KERNEL_OK")
</pallas_src>

<mosaic_0001>
module attributes {stable_mosaic.version = 11 : i64} {
  func.func @_cosine_kernel(%arg0: i32, %arg1: i32, %arg2: i32, %arg3: memref<8x32xf32, #tpu.memory_space<vmem>>, %arg4: memref<32x16xf32, #tpu.memory_space<vmem>>, %arg5: memref<8x16xf32, #tpu.memory_space<vmem>>, %arg6: memref<8x1xf32, #tpu.memory_space<vmem>>, %arg7: memref<1x16xf32, #tpu.memory_space<vmem>>) attributes {dimension_semantics = [#tpu.dimension_semantics<parallel>, #tpu.dimension_semantics<parallel>, #tpu.dimension_semantics<arbitrary>], iteration_bounds = array<i64: 1, 1, 1>, scalar_prefetch = 0 : i64, scratch_operands = 2 : i64, tpu.core_type = #tpu.core_type<tc>, window_params = [{transform_indices = @transform_0, window_bounds = array<i64: 8, 32>}, {transform_indices = @transform_1, window_bounds = array<i64: 32, 16>}, {transform_indices = @transform_2, window_bounds = array<i64: 8, 16>}]} {
    %c0_i32 = arith.constant 0 : i32
    %0 = arith.cmpi eq, %arg2, %c0_i32 : i32
    %1 = arith.extui %0 : i1 to i32
    %c0_i32_0 = arith.constant 0 : i32
    %2 = arith.cmpi ne, %1, %c0_i32_0 : i32
    scf.if %2 {
      %cst_20 = arith.constant 0.000000e+00 : f32
      %24 = vector.broadcast %cst_20 : f32 to vector<8x16xf32>
      %c0_21 = arith.constant 0 : index
      %c0_22 = arith.constant 0 : index
      %25 = vector.load %arg5[%c0_21, %c0_22] : memref<8x16xf32, #tpu.memory_space<vmem>>, vector<8x16xf32>
      tpu.vector_store %arg5[%c0_21, %c0_22], %24 {strides = array<i32>} : memref<8x16xf32, #tpu.memory_space<vmem>>, vector<8x16xf32>,
      %cst_23 = arith.constant 0.000000e+00 : f32
      %26 = vector.broadcast %cst_23 : f32 to vector<8x1xf32>
      %c0_24 = arith.constant 0 : index
      %c0_25 = arith.constant 0 : index
      %27 = vector.load %arg6[%c0_24, %c0_25] : memref<8x1xf32, #tpu.memory_space<vmem>>, vector<8x1xf32>
      tpu.vector_store %arg6[%c0_24, %c0_25], %26 {strides = array<i32>} : memref<8x1xf32, #tpu.memory_space<vmem>>, vector<8x1xf32>,
      %cst_26 = arith.constant 0.000000e+00 : f32
      %28 = vector.broadcast %cst_26 : f32 to vector<1x16xf32>
      %c0_27 = arith.constant 0 : index
      %c0_28 = arith.constant 0 : index
      %29 = vector.load %arg7[%c0_27, %c0_28] : memref<1x16xf32, #tpu.memory_space<vmem>>, vector<1x16xf32>
      tpu.vector_store %arg7[%c0_27, %c0_28], %28 {strides = array<i32>} : memref<1x16xf32, #tpu.memory_space<vmem>>, vector<1x16xf32>,
    } else {
    }
    %c0 = arith.constant 0 : index
    %c0_1 = arith.constant 0 : index
    %3 = vector.load %arg3[%c0, %c0_1] : memref<8x32xf32, #tpu.memory_space<vmem>>, vector<8x32xf32>
    %c0_2 = arith.constant 0 : index
    %c0_3 = arith.constant 0 : index
    %4 = vector.load %arg4[%c0_2, %c0_3] : memref<32x16xf32, #tpu.memory_space<vmem>>, vector<32x16xf32>
    %c0_4 = arith.constant 0 : index
    %c0_5 = arith.constant 0 : index
    %5 = vector.load %arg5[%c0_4, %c0_5] : memref<8x16xf32, #tpu.memory_space<vmem>>, vector<8x16xf32>
    %cst = arith.constant dense<0.000000e+00> : vector<8x16xf32>
    %6 = tpu.matmul %3, %4, %cst {dimension_numbers = #tpu.dot_dimension_numbers<[1], [0], [0], [1], [0, 0, 1, 1], [], []>} : vector<8x32xf32>, vector<32x16xf32>, vector<8x16xf32> -> vector<8x16xf32>
    %7 = arith.addf %5, %6 : vector<8x16xf32>
    %c0_6 = arith.constant 0 : index
    %c0_7 = arith.constant 0 : index
    %8 = vector.load %arg5[%c0_6, %c0_7] : memref<8x16xf32, #tpu.memory_space<vmem>>, vector<8x16xf32>
    tpu.vector_store %arg5[%c0_6, %c0_7], %7 {strides = array<i32>} : memref<8x16xf32, #tpu.memory_space<vmem>>, vector<8x16xf32>,
    %c0_8 = arith.constant 0 : index
    %c0_9 = arith.constant 0 : index
    %9 = vector.load %arg6[%c0_8, %c0_9] : memref<8x1xf32, #tpu.memory_space<vmem>>, vector<8x1xf32>
    %10 = arith.mulf %3, %3 : vector<8x32xf32>
    %cst_10 = arith.constant dense<0.000000e+00> : vector<8xf32>
    %11 = vector.multi_reduction <add>, %10, %cst_10 [1] : vector<8x32xf32> to vector<8xf32>
    %12 = vector.shape_cast %11 : vector<8xf32> to vector<8x1xf32>
    %13 = arith.addf %9, %12 : vector<8x1xf32>
    %c0_11 = arith.constant 0 : index
    %c0_12 = arith.constant 0 : index
    %14 = vector.load %arg6[%c0_11, %c0_12] : memref<8x1xf32, #tpu.memory_space<vmem>>, vector<8x1xf32>
    tpu.vector_store %arg6[%c0_11, %c0_12], %13 {strides = array<i32>} : memref<8x1xf32, #tpu.memory_space<vmem>>, vector<8x1xf32>,
    %c0_13 = arith.constant 0 : index
    %c0_14 = arith.constant 0 : index
    %15 = vector.load %arg7[%c0_13, %c0_14] : memref<1x16xf32, #tpu.memory_space<vmem>>, vector<1x16xf32>
    %16 = arith.mulf %4, %4 : vector<32x16xf32>
    %cst_15 = arith.constant dense<0.000000e+00> : vector<16xf32>
    %17 = vector.multi_reduction <add>, %16, %cst_15 [0] : vector<32x16xf32> to vector<16xf32>
    %18 = vector.shape_cast %17 : vector<16xf32> to vector<1x16xf32>
    %19 = arith.addf %15, %18 : vector<1x16xf32>
    %c0_16 = arith.constant 0 : index
    %c0_17 = arith.constant 0 : index
    %20 = vector.load %arg7[%c0_16, %c0_17] : memref<1x16xf32, #tpu.memory_space<vmem>>, vector<1x16xf32>
    tpu.vector_store %arg7[%c0_16, %c0_17], %19 {strides = array<i32>} : memref<1x16xf32, #tpu.memory_space<vmem>>, vector<1x16xf32>,
    %c0_i32_18 = arith.constant 0 : i32
    %21 = arith.cmpi eq, %arg2, %c0_i32_18 : i32
    %22 = arith.extui %21 : i1 to i32
    %c0_i32_19 = arith.constant 0 : i32
    %23 = arith.cmpi ne, %22, %c0_i32_19 : i32
    scf.if %23 {
      %c0_20 = arith.constant 0 : index
      %c0_21 = arith.constant 0 : index
      %24 = vector.load %arg6[%c0_20, %c0_21] : memref<8x1xf32, #tpu.memory_space<vmem>>, vector<8x1xf32>
      %c0_22 = arith.constant 0 : index
      %c0_23 = arith.constant 0 : index
      %25 = vector.load %arg7[%c0_22, %c0_23] : memref<1x16xf32, #tpu.memory_space<vmem>>, vector<1x16xf32>
      %26 = math.rsqrt %24 : vector<8x1xf32>
      %27 = math.rsqrt %25 : vector<1x16xf32>
      %28 = vector.broadcast %24 : vector<8x1xf32> to vector<8x16xf32>
      %29 = vector.broadcast %25 : vector<1x16xf32> to vector<8x16xf32>
      %30 = arith.mulf %28, %29 : vector<8x16xf32>
      %cst_24 = arith.constant 1.000000e-16 : f32
      %31 = vector.broadcast %cst_24 : f32 to vector<8x16xf32>
      %32 = arith.cmpf olt, %30, %31 : vector<8x16xf32>
      %33 = vector.broadcast %26 : vector<8x1xf32> to vector<8x16xf32>
      %34 = vector.broadcast %27 : vector<1x16xf32> to vector<8x16xf32>
      %35 = arith.mulf %33, %34 : vector<8x16xf32>
      %cst_25 = arith.constant 1.000000e+08 : f32
      %36 = vector.broadcast %cst_25 : f32 to vector<8x16xf32>
      %37 = arith.select %32, %36, %35 : vector<8x16xi1>, vector<8x16xf32>
      %c0_26 = arith.constant 0 : index
      %c0_27 = arith.constant 0 : index
      %38 = vector.load %arg5[%c0_26, %c0_27] : memref<8x16xf32, #tpu.memory_space<vmem>>, vector<8x16xf32>
      %39 = arith.mulf %38, %37 : vector<8x16xf32>
      %c0_28 = arith.constant 0 : index
      %c0_29 = arith.constant 0 : index
      %40 = vector.load %arg5[%c0_28, %c0_29] : memref<8x16xf32, #tpu.memory_space<vmem>>, vector<8x16xf32>
      tpu.vector_store %arg5[%c0_28, %c0_29], %39 {strides = array<i32>} : memref<8x16xf32, #tpu.memory_space<vmem>>, vector<8x16xf32>,
    } else {
    }
    return
  }
  func.func @transform_0(%arg0: i32, %arg1: i32, %arg2: i32) -> (i32, i32) {
    %c0_i32 = arith.constant 0 : i32
    return %arg0, %arg2 : i32, i32
  }
  func.func @transform_1(%arg0: i32, %arg1: i32, %arg2: i32) -> (i32, i32) {
    %c0_i32 = arith.constant 0 : i32
    return %arg2, %arg1 : i32, i32
  }
  func.func @transform_2(%arg0: i32, %arg1: i32, %arg2: i32) -> (i32, i32) {
    %c0_i32 = arith.constant 0 : i32
    return %arg0, %arg1 : i32, i32
  }
}

</mosaic_0001>

<bundles_post_ra>
// kernel: cosine_layer_forward.1
= control target key start
LH: loop header
LB: loop body
LE: loop exit
PB: predicated region body
PF: predicated region fallthrough
CT: control target
= control target key end

     0   :  { %vm28_vm0 = vcmask 261120   ;;  %vm16_vm1 = vcmask 130048   ;;  %v233_v4 = vmov 0.0   ;;  %vm20_vm2 = vcmask 122880   ;;  %s283_s0 = inlined_call_operand.vmem [shape: f32[8,32], index: 0, kind: input, shape index: {}]   ;;  %s284_s1 = inlined_call_operand.vmem [shape: f32[32,16], index: 1, kind: input, shape index: {}]   ;;  %s285_s2 = inlined_call_operand.hbm [shape: f32[8,16], index: 2, kind: output, shape index: {}]  }
   0x1   :  { %v22_v0 = vld [vmem:[%s283_s0] sm:$0xff]  ;;  %v26_v1 = vld [vmem:[%s284_s1 + $0x18] sm:$0xff]  ;;  %v25_v2 = vld [vmem:[%s284_s1 + $0x10] sm:$0xff]  ;;  %190 = vmatprep.subr.mxu0 %v233_v4  ;;  %17 = vst.msk [vmem:[#allocation4] sm:$0xff] %vm16_vm1, %v233_v4 }
   0x2   :  { %v106_v3 = vmul.f32 %v22_v0, %v22_v0  ;;  %v116_v5 = vmul.f32 %v25_v2, %v25_v2  ;;  %v24_v6 = vld [vmem:[%s284_s1 + $0x8] sm:$0xff]  ;;  %v23_v7 = vld [vmem:[%s284_s1] sm:$0xff] }
   0x3   :  { %7 = vsyncpa [#allocation5], 0  ;;  %191 = vmatpush3.msra.mxu0 %v26_v1  ;;  %v117_v8 = vmul.f32 %v26_v1, %v26_v1  ;;  %v115_v9 = vmul.f32 %v24_v6, %v24_v6  ;;  %21 = vst.msk [vmem:[#allocation3] sm:$0x1] %vm20_vm2, %v233_v4  ;;  %v114_v10 = vmul.f32 %v23_v7, %v23_v7  ;;  %vm234_vm3 = vmmov 0   ;;  %s236_s1 = smov [#allocation4]  }
   0x4   :  { %v107_v11 = vsel %vm28_vm0, %v106_v3, 0.0  ;;  %192 = vmatprep.subr.mxu0 %v233_v4  ;;  %198 = vmatprep.mubr.msk.f32.mxu0 %vm234_vm3, %v233_v4  ;;  %v121_v12 = vsel %vm16_vm1, %v116_v5, 0.0  ;;  %vm18_vm4 = vcmask 7168   ;;  %v235_v23 = vmov 0   ;;  %s176_s18 = sshll.u32 %s236_s1, 4  ;;  %s177_s18 = int_to_ptr.vmem [resolvable:$true] %s176_s18 }
   0x5   :  { %108 = vadd.xlane.f32.xlu0 %v107_v11  ;;  %193 = vmatpush3.msra.mxu0 %v25_v2  ;;  %v119_v13 = vsel %vm16_vm1, %v115_v9, 0.0  ;;  %v118_v14 = vsel %vm16_vm1, %v114_v10, 0.0  ;;  %v123_v16 = vsel %vm16_vm1, %v117_v8, 0.0  ;;  %19 = vst.msk [vmem:[#allocation2] sm:$0xff] %vm18_vm4, %v233_v4  ;;  %v147_v38 = vlaneseq  ;;  %s211_s19 = scalar_lea.vmem %s177_s18, 128  ;;  %p216_p1 = scmp.lt.s32.totalorder %s177_s18, %s177_s18 }
   0x6   :  { %194 = vmatprep.subr.mxu0 %v233_v4  ;;  %v120_v15 = vadd.f32 %v119_v13, %v118_v14  ;;  %205 = vset.pattern.permute.xlu0 %v235_v23  ;;  %p212_p0 = scmp.ne.s32.totalorder %s177_s18, %s211_s19  ;;  %p217_p2 = scmp.lt.s32.totalorder %s211_s19, %s211_s19 }
   0x7   :  { %195 = vmatpush3.msra.mxu0 %v24_v6  ;;  %206 = vset.pattern.permute.xlu1 %v235_v23  ;;  %v148_v39 = vshrl.u32 %v147_v38, 7 }
   0x8   :  { %196 = vmatprep.subr.mxu0 %v233_v4  ;;  %v122_v17 = vadd.f32 %v121_v12, %v120_v15  ;;  %v27_v33 = vld [vmem:[#allocation4] sm:$0xff]  ;;  %p218_p3 = por %p217_p2, %p216_p1 }
   0x9   :  { %197 = vmatpush3.msra.mxu0 %v23_v7  ;;  %v149_v40 = vsub.s32 0, %v148_v39 }
   0xa   :  { %v124_v18 = vadd.f32 %v123_v16, %v122_v17  ;;  %199 = vmatmul.mubr.msk.f32.vlgmr.msra.gmra.mxu0 %vm28_vm0, %v22_v0  ;;  %v113_v25 = vld [vmem:[#allocation3] sm:$0x1]  ;;  %p219_p4 = pnand %p218_p3, %p212_p0 }
   0xc   :  { %v125_v19 = vrot.slane %v124_v18, 4  ;;  %v105_v28 = vld [vmem:[#allocation2] sm:$0xff] }
   0xe   :  { %v126_v20 = vadd.f32 %v125_v19, %v124_v18 }
  0x10   :  { %v127_v21 = vrot.slane %v126_v20, 2 }
  0x12   :  { %v128_v22 = vadd.f32 %v127_v21, %v126_v20 }
  0x14   :  { %v129_v24 = vrot.slane %v128_v22, 1 }
  0x16   :  { %v130_v26 = vadd.f32 %v129_v24, %v128_v22 }
  0x18   :  { %v131_v27 = vadd.f32 %v130_v26, %v113_v25 }
  0x1a   :  { %133 = vst.msk [vmem:[#allocation3] sm:$0x1] %vm20_vm2, %v131_v27 }
  0x21   :  { %v138_v37 = vld [vmem:[#allocation3] sm:$0x1] }
  0x22   :  { %v150_v42 = vrot.slane %v138_v37, %v149_v40 }
  0x8e   :  { %v109_v29 = vpop.xlane.xlu0 %108 }
  0x8f   :  { %v110_v30 = vadd.f32 %v109_v29, %v105_v28 }
  0x91   :  { %112 = vst.msk [vmem:[#allocation2] sm:$0xff] %vm18_vm4, %v110_v30 }
  0x98   :  { %v137_v31 = vld [vmem:[#allocation2] sm:$0xff] }
  0x99   :  { %143 = vperm.xlu0 %205, %v137_v31   ;;  %207 = vrsqrt.f32 %v137_v31 }
  0x9a   :  { %209 = vrsqrt.f32 %v138_v37 }
  0xa6   :  { %v208_v32 = vpop.eup %207 }
  0xa7   :  { %156 = vperm.xlu1 %206, %v208_v32   ;;  %v210_v41 = vpop.eup %209 }
  0xa8   :  { %v163_v44 = vrot.slane %v210_v41, %v149_v40 }
  0xca   :  { %v98_v34 = vpop.f32.mrf.mxu0 }
  0xcb   :  { %v102_v35 = vadd.f32 %v98_v34, %v27_v33 }
  0xcc   :  { %v200_v36 = vpop.f32.mrf.mxu0 }
  0xcd   :  { %104 = vst.msk [vmem:[#allocation4] sm:$0xff] %vm16_vm1, %v102_v35 }
  0xd4   :  { %v167_v48 = vld [vmem:[#allocation4] sm:$0xff] }
 0x114   :  { %v144_v43 = vpop.permute.xlu0 %143 }
 0x115   :  { %v152_v45 = vmul.f32 %v150_v42, %v144_v43 }
 0x117   :  { %vm153_vm5 = vcmp.lt.f32.partialorder %v152_v45, 1e-16 }
 0x122   :  { %v157_v46 = vpop.permute.xlu1 %156 }
 0x123   :  { %v165_v47 = vmul.f32 %v163_v44, %v157_v46 }
 0x125   :  { %v166_v49 = vsel %vm153_vm5, 1e+08, %v165_v47 }
 0x126   :  { %v168_v50 = vmul.f32 %v167_v48, %v166_v49 }
 0x128   :  { %169 = vst.msk [vmem:[#allocation4] sm:$0xff] %vm16_vm1, %v168_v50 }
 0x129   :  { %222 = shalt.err (!%p219_p4)
}
 0x12a   :  { %179 = dma.vmem_to_hbm [thread:$0]  %s177_s18, 128, %s285_s2, [#allocation5]  }
 0x12b   :  { %231 = dma.done.wait [#allocation5], 128  }
 0x12c   :  { %232 = vsyncadd [#allocation5], 4294967168 }
 0x12d   :  { %183 = vsyncpa [#allocation5], 1 }

</bundles_post_ra>
